<compile_context>
chip_gen: v6e
topology: v6e:2x2x1
jax: 0.10.0
libtpu: 0.0.40
codegen_flags: <defaults>
</compile_context>

<pallas_src>
import jax
import jax.numpy as jnp
from jax.experimental import pallas as pl
from jax.experimental.pallas import tpu as pltpu

_LANE = 128
_WIDTH_CANDIDATES = (4096, 2048, 1024, 512, 256, 128)   # lane widths, widest first
_RAGGED_WIDTH = 1024
_MIN_GRID_STEPS = 8   # >= 4 steps per v7x TensorCore keeps DMA/compute overlapped


def _hswish_kernel(x_ref, o_ref):
    # relu6(x + 3) = clamp(x + 3, 0, 6); all VPU elementwise, computed in f32.
    x = x_ref[...].astype(jnp.float32)
    r6 = jnp.clip(x + 3.0, 0.0, 6.0)
    o_ref[...] = (x * r6 * (1.0 / 6.0)).astype(o_ref.dtype)


def _sublane_multiple(dtype) -> int:
    # Packed dtypes tile as (8,128) f32 / (16,128) bf16 / (32,128) fp8.
    return max(8, 32 // jnp.dtype(dtype).itemsize)


def _vmem_budget_bytes() -> int:
    # Generation-aware scoped-VMEM budget: stay well under physical VMEM
    # (64 MiB/TC on v7x, 128 MiB on v5e/v6e) and leave headroom for Mosaic's
    # internal scratch.  2 arrays x 2 pipeline buffers x ~4 MiB = 16 MiB live.
    try:
        phys = getattr(pltpu.get_tpu_info(), "vmem_capacity_bytes", 64 << 20)
    except Exception:
        phys = 64 << 20
    return min(32 << 20, phys // 2)


def hswish(x: jax.Array, *, donate: bool = False) -> jax.Array:
    """Elementwise hard-swish: x * relu6(x + 3) / 6.  Any shape, float dtype.

    Set donate=True only when the caller donates x (jit donate_argnums): the
    kernel output then aliases the input HBM buffer.  Without donation XLA
    would insert a defensive copy, so the default is False.
    """
    orig_shape = x.shape
    dtype = x.dtype
    if not jnp.issubdtype(dtype, jnp.floating):
        raise TypeError(f"hswish expects a floating dtype, got {dtype}")
    n = int(x.size)
    if n == 0:
        return x

    itemsize = jnp.dtype(dtype).itemsize
    sublane = _sublane_multiple(dtype)

    # ---- choose a wide, lane-dense 2D view (rows, width), width % 128 == 0 ----
    flat = x.reshape(-1)
    if n % _LANE == 0:
        # Copy-free path: widest width that divides n, preferring at least one
        # full sublane tile worth of rows.
        width = next((w for w in _WIDTH_CANDIDATES
                      if n % w == 0 and n // w >= sublane), None)
        if width is None:
            width = next(w for w in _WIDTH_CANDIDATES if n % w == 0)
        padded_n = n
    else:
        # Ragged numel: zero-pad to a wide lane width (hswish(0)=0) and slice
        # the tail off afterwards.  Correct but ~2 extra HBM passes.
        # TODO(synk): handle the tail in-kernel instead (x in HBM via
        # BlockSpec(memory_space=pl.ANY) + chunked manual make_async_copy with
        # a static-length short final copy) so non-128-aligned shapes also sit
        # at roofline.
        width = _RAGGED_WIDTH
        padded_n = -(-n // width) * width
        flat = jnp.pad(flat, (0, padded_n - n))
    rows = padded_n // width
    x2d = flat.reshape(rows, width)

    # ---- block sizing: ~budget/8 bytes per block, sublane-aligned rows -------
    budget = _vmem_budget_bytes()
    target_block_bytes = budget // 8   # 4 live buffers (in+out, double-buffered) + 2x headroom
    cap_rows = max(
        sublane,
        (target_block_bytes // (width * itemsize)) // sublane * sublane,
    )
    if rows <= sublane:
        block_rows = rows              # single full-extent block (always a legal shape)
    else:
        # Aim for >= _MIN_GRID_STEPS grid steps (v7x: both TCs pipelined),
        # capped at the target block size; cdiv grid masks the ragged last block.
        per_step = -(-rows // _MIN_GRID_STEPS)            # ceil
        per_step = -(-per_step // sublane) * sublane      # ceil to sublane multiple
        block_rows = max(sublane, min(cap_rows, per_step))
    grid = (-(-rows // block_rows),)

    out2d = pl.pallas_call(
        _hswish_kernel,
        out_shape=jax.ShapeDtypeStruct((rows, width), dtype),
        grid_spec=pltpu.PrefetchScalarGridSpec(
            num_scalar_prefetch=0,
            grid=grid,
            in_specs=[pl.BlockSpec((block_rows, width), lambda i: (i, 0))],
            out_specs=pl.BlockSpec((block_rows, width), lambda i: (i, 0)),
        ),
        compiler_params=pltpu.CompilerParams(
            dimension_semantics=("parallel",),
            vmem_limit_bytes=budget,
        ),
        cost_estimate=pl.CostEstimate(
            flops=5 * padded_n,
            transcendentals=0,
            bytes_accessed=2 * padded_n * itemsize,
        ),
        input_output_aliases=({0: 0} if donate else {}),
    )(x2d)

    if padded_n == n:
        return out2d.reshape(orig_shape)
    return out2d.reshape(-1)[:n].reshape(orig_shape)


if __name__ == "__main__":
    def ref_hswish(a):
        a32 = a.astype(jnp.float32)
        return (a32 * jnp.clip(a32 + 3.0, 0.0, 6.0) / 6.0).astype(a.dtype)

    # NCHW, matching the PyTorch conv convention (128-aligned, copy-free path).
    x = jax.random.normal(jax.random.PRNGKey(0), (2, 4, 16, 16), dtype=jnp.float32) * 4.0
    y = jax.block_until_ready(hswish(x))
    assert y.shape == x.shape and y.dtype == x.dtype
    assert jnp.allclose(y, ref_hswish(x), atol=1e-6, rtol=1e-5)

    # Non-128-aligned shape exercises the padded ragged path.
    x2 = jax.random.normal(jax.random.PRNGKey(1), (3, 5, 7, 11), dtype=jnp.float32) * 4.0
    y2 = jax.block_until_ready(hswish(x2))
    assert y2.shape == x2.shape and y2.dtype == x2.dtype
    assert jnp.allclose(y2, ref_hswish(x2), atol=1e-6, rtol=1e-5)

    # bf16 path (f32 internal compute, cast back on store).
    xb = x.astype(jnp.bfloat16)
    yb = jax.block_until_ready(hswish(xb))
    assert yb.shape == xb.shape and yb.dtype == jnp.bfloat16
    assert jnp.allclose(yb.astype(jnp.float32), ref_hswish(xb).astype(jnp.float32),
                        atol=2e-2, rtol=2e-2)

    # Donated / aliased path: output reuses the input HBM buffer.
    x3 = jax.random.normal(jax.random.PRNGKey(2), (2, 4, 16, 16), dtype=jnp.float32) * 4.0
    y3_ref = ref_hswish(x3)
    y3 = jax.block_until_ready(
        jax.jit(lambda a: hswish(a, donate=True), donate_argnums=0)(x3))
    assert y3.shape == y3_ref.shape and y3.dtype == y3_ref.dtype
    assert jnp.allclose(y3, y3_ref, atol=1e-6, rtol=1e-5)

    print("KERNEL_OK")
</pallas_src>

<mosaic_0001>
module attributes {stable_mosaic.version = 11 : i64} {
  func.func @_hswish_kernel(%arg0: i32, %arg1: memref<8x256xf32, #tpu.memory_space<vmem>>, %arg2: memref<8x256xf32, #tpu.memory_space<vmem>>) attributes {dimension_semantics = [#tpu.dimension_semantics<parallel>], iteration_bounds = array<i64: 1>, scalar_prefetch = 0 : i64, scratch_operands = 0 : i64, tpu.core_type = #tpu.core_type<tc>, window_params = [{transform_indices = @transform_0, window_bounds = array<i64: 8, 256>}, {transform_indices = @transform_1, window_bounds = array<i64: 8, 256>}]} {
    %c0 = arith.constant 0 : index
    %c0_0 = arith.constant 0 : index
    %0 = vector.load %arg1[%c0, %c0_0] : memref<8x256xf32, #tpu.memory_space<vmem>>, vector<8x256xf32>
    %cst = arith.constant 3.000000e+00 : f32
    %1 = vector.broadcast %cst : f32 to vector<8x256xf32>
    %2 = arith.addf %0, %1 : vector<8x256xf32>
    %cst_1 = arith.constant 0.000000e+00 : f32
    %cst_2 = arith.constant 6.000000e+00 : f32
    %3 = vector.broadcast %cst_1 : f32 to vector<8x256xf32>
    %4 = arith.maximumf %3, %2 : vector<8x256xf32>
    %5 = vector.broadcast %cst_2 : f32 to vector<8x256xf32>
    %6 = arith.minimumf %5, %4 : vector<8x256xf32>
    %7 = arith.mulf %0, %6 : vector<8x256xf32>
    %cst_3 = arith.constant 0.166666672 : f32
    %8 = vector.broadcast %cst_3 : f32 to vector<8x256xf32>
    %9 = arith.mulf %7, %8 : vector<8x256xf32>
    %c0_4 = arith.constant 0 : index
    %c0_5 = arith.constant 0 : index
    %10 = vector.load %arg2[%c0_4, %c0_5] : memref<8x256xf32, #tpu.memory_space<vmem>>, vector<8x256xf32>
    tpu.vector_store %arg2[%c0_4, %c0_5], %9 {strides = array<i32>} : memref<8x256xf32, #tpu.memory_space<vmem>>, vector<8x256xf32>,
    return
  }
  func.func @transform_0(%arg0: i32) -> (i32, i32) {
    %c0_i32 = arith.constant 0 : i32
    %c0_i32_0 = arith.constant 0 : i32
    return %arg0, %c0_i32 : i32, i32
  }
  func.func @transform_1(%arg0: i32) -> (i32, i32) {
    %c0_i32 = arith.constant 0 : i32
    %c0_i32_0 = arith.constant 0 : i32
    return %arg0, %c0_i32 : i32, i32
  }
}

</mosaic_0001>

<bundles_post_ra>
// kernel: tpu_custom_call.1
= control target key start
LH: loop header
LB: loop body
LE: loop exit
PB: predicated region body
PF: predicated region fallthrough
CT: control target
= control target key end

     0   :  { %6 = vsyncpa [#allocation3], 0  ;;  %s114_s0 = inlined_call_operand.hbm [shape: f32[8,256], index: 0, kind: input, shape index: {}]   ;;  %s115_s1 = inlined_call_operand.hbm [shape: f32[8,256], index: 1, kind: output, shape index: {}]  }
   0x1   :  { %7 = vsyncpa [#allocation4], 0  ;;  %s96_s6 = smov [#allocation2]  }
   0x2   :  { %s14_s7 = sshll.u32 %s96_s6, 4  ;;  %s15_s7 = int_to_ptr.vmem [resolvable:$true] %s14_s7 }
   0x3   :  { %s60_s8 = scalar_lea.vmem %s15_s7, 256  ;;  %p65_p1 = scmp.lt.s32.totalorder %s15_s7, %s15_s7 }
   0x4   :  { %p61_p0 = scmp.ne.s32.totalorder %s15_s7, %s60_s8  ;;  %p66_p2 = scmp.lt.s32.totalorder %s60_s8, %s60_s8 }
   0x6   :  { %p67_p3 = por %p66_p2, %p65_p1 }
   0x8   :  { %p68_p4 = pnand %p67_p3, %p61_p0 }
   0xa   :  { %71 = shalt.err (!%p68_p4)
}
   0xb   :  { %17 = dma.hbm_to_vmem [thread:$0]  %s114_s0, 256, %s15_s7, [#allocation3]  }
   0xc   :  { %92 = dma.done.wait [#allocation3], 256  }
   0xd   :  { %93 = vsyncadd [#allocation3], 4294967040  ;;  %v21_v0 = vld [vmem:[#allocation2] sm:$0xff]  ;;  %v22_v1 = vld [vmem:[#allocation2 + $0x8] sm:$0xff]  ;;  %s97_s11 = smov [#allocation5]  }
   0xe   :  { %v23_v2 = vadd.f32 3.0, %v21_v0  ;;  %v24_v3 = vadd.f32 3.0, %v22_v1  ;;  %s41_s12 = sshll.u32 %s97_s11, 4  ;;  %s42_s12 = int_to_ptr.vmem [resolvable:$true] %s41_s12 }
   0xf   :  { %s72_s0 = scalar_lea.vmem %s42_s12, 256  ;;  %p77_p6 = scmp.lt.s32.totalorder %s42_s12, %s42_s12 }
  0x10   :  { %v25_v4 = vmax.f32 %v23_v2, 0.0  ;;  %v26_v5 = vmax.f32 %v24_v3, 0.0  ;;  %p73_p5 = scmp.ne.s32.totalorder %s42_s12, %s72_s0  ;;  %p78_p7 = scmp.lt.s32.totalorder %s72_s0, %s72_s0 }
  0x12   :  { %v27_v6 = vmin.f32 %v25_v4, 6.0  ;;  %v28_v7 = vmin.f32 %v26_v5, 6.0  ;;  %p79_p8 = por %p78_p7, %p77_p6 }
  0x14   :  { %v29_v8 = vmul.f32 %v27_v6, %v21_v0  ;;  %v30_v9 = vmul.f32 %v28_v7, %v22_v1  ;;  %p80_p9 = pnand %p79_p8, %p73_p5 }
  0x16   :  { %v31_v10 = vmul.f32 0.16666667, %v29_v8  ;;  %v32_v11 = vmul.f32 0.16666667, %v30_v9 }
  0x18   :  { %33 = vst [vmem:[#allocation5] sm:$0xff] %v31_v10  ;;  %34 = vst [vmem:[#allocation5 + $0x8] sm:$0xff] %v32_v11 }
  0x19   :  { %83 = shalt.err (!%p80_p9)
}
  0x1a   :  { %44 = dma.vmem_to_hbm [thread:$0]  %s42_s12, 256, %s115_s1, [#allocation4]  }
  0x1b   :  { %94 = dma.done.wait [#allocation4], 256  }
  0x1c   :  { %95 = vsyncadd [#allocation4], 4294967040 }
  0x1d   :  { %48 = vsyncpa [#allocation3], 1 }
  0x1e   :  { %49 = vsyncpa [#allocation4], 1 }

</bundles_post_ra>
